<compile_context>
chip_gen: v7x
topology: tpu7x:2x2x1
jax: 0.10.0
libtpu: 0.0.40
codegen_flags: <defaults>
</compile_context>

<pallas_src>
import functools

import jax
import jax.numpy as jnp
from jax.experimental import pallas as pl
from jax.experimental.pallas import tpu as pltpu


def _round_up(x, m):
    return ((x + m - 1) // m) * m


def _sublane(dtype):
    itemsize = jnp.dtype(dtype).itemsize
    if itemsize >= 4:
        return 8
    if itemsize == 2:
        return 16
    return 32


def _vmem_capacity_bytes():
    # Generation-aware VMEM capacity; fall back to the smallest (v7x, 64 MiB).
    try:
        return int(pltpu.get_tpu_info().vmem_capacity_bytes)
    except Exception:
        return 64 * 1024 * 1024


def _choose_block_m(M, K, split_sizes, dtype):
    """Pick a row-tile size that amortizes per-step overhead yet fits VMEM."""
    itemsize = jnp.dtype(dtype).itemsize
    sub = _sublane(dtype)

    vmem_cap = _vmem_capacity_bytes()
    # Keep the double-buffered pipeline well under physical VMEM on every
    # generation (48 MiB on v5e/v6e's 128 MiB, 48 MiB on v7x's 64 MiB).
    budget = min(48 * 1024 * 1024, (vmem_cap * 3) // 4)

    # Lane-padding-aware VMEM bytes per row: the input row plus every output
    # row, each padded up to a 128-lane multiple in VMEM.
    row_bytes = _round_up(K, 128) * itemsize
    for s in split_sizes:
        row_bytes += _round_up(s, 128) * itemsize

    bm_vmem = budget // (2 * row_bytes)  # /2 for double buffering
    # DMA-granularity target: >= ~2 MiB input tile per grid step and >= 512
    # rows (narrow K needs proportionally more rows to stay near roofline).
    bm_target = max(512, (2 * 1024 * 1024) // max(1, K * itemsize))
    bm = min(bm_target, bm_vmem)

    # v7x megacore: keep at least 2 row steps so both TensorCores get work.
    if M > 2 * sub:
        bm = min(bm, _round_up(pl.cdiv(M, 2), sub))
    bm = min(bm, _round_up(M, sub))

    # Dtype-native sublane rounding; floor at one native tile of rows.
    bm = max(sub, (bm // sub) * sub)
    # TODO(synk): for extremely wide K where even bm == sub exceeds the VMEM
    # budget, add a column-tiled (second grid axis) fallback.
    return int(bm), row_bytes, vmem_cap


def _make_split_kernel(split_sizes):
    """Build a kernel that copies static last-dim slices to each output."""
    offsets = []
    off = 0
    for s in split_sizes:
        offsets.append(off)
        off += s

    def kernel(x_ref, *out_refs):
        # One row-tile of the input is resident; write each slice out.
        for o_ref, start, size in zip(out_refs, offsets, split_sizes):
            o_ref[...] = x_ref[:, start:start + size]

    return kernel


@functools.partial(jax.jit, static_argnames=("split_sizes", "block_m"))
def split_pallas(x, *, split_sizes, block_m=None):
    """Equivalent of torch.split(x, split_sizes, dim=-1). Returns a tuple."""
    split_sizes = tuple(int(s) for s in split_sizes)
    K = x.shape[-1]
    assert sum(split_sizes) == K, "split sizes must sum to the last dim"
    lead_shape = x.shape[:-1]
    itemsize = jnp.dtype(x.dtype).itemsize

    x2d = x.reshape(-1, K)  # (M, K)
    M = x2d.shape[0]

    if block_m is None:
        block_m, row_bytes, vmem_cap = _choose_block_m(M, K, split_sizes,
                                                       x.dtype)
    else:
        block_m = int(block_m)
        _, row_bytes, vmem_cap = _choose_block_m(M, K, split_sizes, x.dtype)

    # No padding: ragged edge blocks are handled by Pallas (OOB input reads
    # are unused, OOB output writes are masked), so HBM traffic stays at one
    # read of x plus one write per output.
    grid = (pl.cdiv(M, block_m),)

    out_shape = tuple(
        jax.ShapeDtypeStruct((M, s), x.dtype) for s in split_sizes
    )
    out_specs = [
        pl.BlockSpec((block_m, s), lambda i: (i, 0)) for s in split_sizes
    ]

    # Explicit scoped-VMEM limit matching the chosen (double-buffered,
    # lane-padded) working set, clamped under physical VMEM.
    needed = 2 * block_m * row_bytes
    vmem_limit = int(min(int(vmem_cap * 0.9),
                         max(needed + (8 << 20), 32 << 20)))

    outs = pl.pallas_call(
        _make_split_kernel(split_sizes),
        out_shape=out_shape,
        grid_spec=pltpu.PrefetchScalarGridSpec(
            num_scalar_prefetch=0,
            grid=grid,
            in_specs=[pl.BlockSpec((block_m, K), lambda i: (i, 0))],
            out_specs=out_specs,
        ),
        compiler_params=pltpu.CompilerParams(
            dimension_semantics=("parallel",),  # row tiles shard across TCs
            vmem_limit_bytes=vmem_limit,
        ),
        cost_estimate=pl.CostEstimate(
            flops=0,
            transcendentals=0,
            bytes_accessed=2 * M * K * itemsize,  # read x + write all splits
        ),
    )(x2d)

    return tuple(o.reshape(*lead_shape, s) for o, s in zip(outs, split_sizes))


# TODO(synk): the PyTorch module can also return a dict keyed by output_shape;
# that container bookkeeping is pure Python, handled by the caller (see main).
# TODO(synk): if profiling shows vst/XLU binds for non-128-aligned splits,
# switch to per-output column-window BlockSpecs so each slice lands at lane 0.


if __name__ == "__main__":
    # Shapes consistent with the module: input (batch, seq, hidden) with
    # hidden = sum(split_sizes). e.g. Split([Size([..,16]), Size([..,16])]).
    batch, seq, hidden = 2, 8, 32
    split_sizes = (16, 16)
    keys = ("mean", "logstd")

    x = jax.random.normal(jax.random.PRNGKey(0), (batch, seq, hidden),
                          jnp.float32)

    outs = split_pallas(x, split_sizes=split_sizes)
    outs = jax.block_until_ready(outs)

    # dict-style output (the module's dict branch), done in the wrapper layer.
    named = dict(zip(keys, outs))

    # Reference check: plain slicing (same math as torch.split).
    off = 0
    for name, s in zip(keys, split_sizes):
        ref = x[..., off:off + s]
        got = named[name]
        assert got.shape == (batch, seq, s)
        assert jnp.array_equal(got, ref)
        off += s

    # Second check: ragged row count (non-divisible M) + uneven split sizes.
    x2 = jax.random.normal(jax.random.PRNGKey(1), (3, 5, 40), jnp.float32)
    sizes2 = (16, 8, 16)
    outs2 = jax.block_until_ready(split_pallas(x2, split_sizes=sizes2))
    off = 0
    for o, s in zip(outs2, sizes2):
        assert o.shape == (3, 5, s)
        assert jnp.array_equal(o, x2[..., off:off + s])
        off += s

    # Third check: bf16 input (dtype-native sublane rounding path).
    x3 = jax.random.normal(jax.random.PRNGKey(2), (4, 6, 24),
                           jnp.bfloat16)
    sizes3 = (8, 16)
    outs3 = jax.block_until_ready(split_pallas(x3, split_sizes=sizes3))
    off = 0
    for o, s in zip(outs3, sizes3):
        assert o.shape == (4, 6, s)
        assert jnp.array_equal(o, x3[..., off:off + s])
        off += s

    print("KERNEL_OK")
</pallas_src>

<mosaic_0001>
module attributes {stable_mosaic.version = 11 : i64} {
  func.func @kernel(%arg0: i32, %arg1: memref<16x32xf32, #tpu.memory_space<vmem>>, %arg2: memref<16x16xf32, #tpu.memory_space<vmem>>, %arg3: memref<16x16xf32, #tpu.memory_space<vmem>>) attributes {dimension_semantics = [#tpu.dimension_semantics<parallel>], iteration_bounds = array<i64: 1>, scalar_prefetch = 0 : i64, scratch_operands = 0 : i64, tpu.core_type = #tpu.core_type<tc>, window_params = [{transform_indices = @transform_0, window_bounds = array<i64: 16, 32>}, {transform_indices = @transform_1, window_bounds = array<i64: 16, 16>}, {transform_indices = @transform_2, window_bounds = array<i64: 16, 16>}]} {
    %c0 = arith.constant 0 : index
    %c0_0 = arith.constant 0 : index
    %0 = vector.load %arg1[%c0, %c0_0] : memref<16x32xf32, #tpu.memory_space<vmem>>, vector<16x16xf32>
    %c0_1 = arith.constant 0 : index
    %c0_2 = arith.constant 0 : index
    %1 = vector.load %arg2[%c0_1, %c0_2] : memref<16x16xf32, #tpu.memory_space<vmem>>, vector<16x16xf32>
    tpu.vector_store %arg2[%c0_1, %c0_2], %0 {strides = array<i32>} : memref<16x16xf32, #tpu.memory_space<vmem>>, vector<16x16xf32>,
    %c0_3 = arith.constant 0 : index
    %c16 = arith.constant 16 : index
    %2 = vector.load %arg1[%c0_3, %c16] : memref<16x32xf32, #tpu.memory_space<vmem>>, vector<16x16xf32>
    %c0_4 = arith.constant 0 : index
    %c0_5 = arith.constant 0 : index
    %3 = vector.load %arg3[%c0_4, %c0_5] : memref<16x16xf32, #tpu.memory_space<vmem>>, vector<16x16xf32>
    tpu.vector_store %arg3[%c0_4, %c0_5], %2 {strides = array<i32>} : memref<16x16xf32, #tpu.memory_space<vmem>>, vector<16x16xf32>,
    return
  }
  func.func @transform_0(%arg0: i32) -> (i32, i32) {
    %c0_i32 = arith.constant 0 : i32
    %c0_i32_0 = arith.constant 0 : i32
    return %arg0, %c0_i32 : i32, i32
  }
  func.func @transform_1(%arg0: i32) -> (i32, i32) {
    %c0_i32 = arith.constant 0 : i32
    %c0_i32_0 = arith.constant 0 : i32
    return %arg0, %c0_i32 : i32, i32
  }
  func.func @transform_2(%arg0: i32) -> (i32, i32) {
    %c0_i32 = arith.constant 0 : i32
    %c0_i32_0 = arith.constant 0 : i32
    return %arg0, %c0_i32 : i32, i32
  }
}

</mosaic_0001>

<bundles_post_ra>
// kernel: split_pallas.1
= control target key start
LH: loop header
LB: loop body
LE: loop exit
PB: predicated region body
PF: predicated region fallthrough
CT: control target
= control target key end

     0   :  { %8 = vsyncpa [#allocation3], 0  ;;  %s224_s0 = inlined_call_operand.hbm [shape: f32[16,32], index: 0, kind: input, shape index: {}]   ;;  %s225_s1 = inlined_call_operand.hbm [shape: f32[16,16], index: 1, kind: output, shape index: {0}]   ;;  %s226_s2 = inlined_call_operand.hbm [shape: f32[16,16], index: 2, kind: output, shape index: {1}]  }
   0x1   :  { %9 = vsyncpa [#allocation4], 0 }
   0x2   :  { %10 = vsyncpa [#allocation7], 0  ;;  %s154_s9 = smov [#allocation2]   ;;  %s82_s13 = scalar_lea.hbm %s224_s0, 256 }
   0x3   :  { %s16_s10 = sshll.u32 %s154_s9, 4  ;;  %p83_p0 = scmp.ne.s32.totalorder %s224_s0, %s82_s13  ;;  %s17_s10 = int_to_ptr.vmem [resolvable:$true] %s16_s10 }
   0x4   :  { %p86_p1 = scmp.lt.u32.totalorder %s82_s13, %s224_s0 }
   0x6   :  { %p88_p2 = pnand %p86_p1, %p83_p0 }
   0x8   :  { %91 = shalt.err (!%p88_p2)
}
   0x9   :  { %s92_s18 = scalar_lea.vmem %s17_s10, 256  ;;  %p97_p4 = scmp.lt.s32.totalorder %s17_s10, %s17_s10 }
   0xa   :  { %p93_p3 = scmp.ne.s32.totalorder %s17_s10, %s92_s18  ;;  %p98_p5 = scmp.lt.s32.totalorder %s92_s18, %s92_s18 }
   0xc   :  { %p99_p6 = por %p98_p5, %p97_p4 }
   0xe   :  { %p100_p7 = pnand %p99_p6, %p93_p3 }
  0x10   :  { %103 = shalt.err (!%p100_p7)
}
  0x11   :  { %s155_s19 = smov 128   ;;  %s156_s20 = smov 8  }
  0x12   :  { %22 = dma.hbm_to_vmem [thread:$0]  %s224_s0, 256, %s17_s10, [#allocation3], %s155_s19, %s155_s19, %s156_s20  }
  0x13   :  { %148 = dma.done.wait [#allocation3], 256  }
  0x14   :  { %149 = vsyncadd [#allocation3], 4294967040  ;;  %s157_s23 = smov [#allocation5]   ;;  %v31_v0 = vld [vmem:[#allocation2] sm:$0xff]  ;;  %v32_v1 = vld [vmem:[#allocation2 + $0x8] sm:$0xff]  ;;  %vm28_vm0 = vcmask 130048  }
  0x15   :  { %s48_s24 = sshll.u32 %s157_s23, 4  ;;  %s158_s25 = smov 112   ;;  %29 = vst.msk [vmem:[#allocation5] sm:$0xff] %vm28_vm0, %v31_v0  ;;  %30 = vst.msk [vmem:[#allocation5 + $0x8] sm:$0xff] %vm28_vm0, %v32_v1  ;;  %s49_s24 = int_to_ptr.vmem [resolvable:$true] %s48_s24 }
  0x16   :  { %35 = vrot.lane.b32.xlu0 %v31_v0, %s158_s25  ;;  %s104_s26 = scalar_lea.vmem %s49_s24, 256  ;;  %p109_p9 = scmp.lt.s32.totalorder %s49_s24, %s49_s24 }
  0x17   :  { %p105_p8 = scmp.ne.s32.totalorder %s49_s24, %s104_s26  ;;  %p110_p10 = scmp.lt.s32.totalorder %s104_s26, %s104_s26 }
  0x19   :  { %p111_p11 = por %p110_p10, %p109_p9 }
  0x1b   :  { %p112_p12 = pnand %p111_p11, %p105_p8 }
  0x1d   :  { %115 = shalt.err (!%p112_p12)
}
  0x1e   :  { %s116_s28 = scalar_lea.hbm %s225_s1, 256 }
  0x1f   :  { %p117_p13 = scmp.ne.s32.totalorder %s225_s1, %s116_s28  ;;  %p120_p0 = scmp.lt.u32.totalorder %s116_s28, %s225_s1 }
  0x21   :  { %p122_p1 = pnand %p120_p0, %p117_p13 }
  0x23   :  { %125 = shalt.err (!%p122_p1)
}
  0x24   :  { %54 = dma.vmem_to_hbm [thread:$0]  %s49_s24, 256, %s225_s1, [#allocation4], %s155_s19, %s155_s19, %s156_s20  }
  0x25   :  { %37 = vrot.lane.b32.xlu0 %v32_v1, %s158_s25  ;;  %s159_s7 = smov [#allocation6]  }
  0x26   :  { %s60_s8 = sshll.u32 %s159_s7, 4  ;;  %s61_s8 = int_to_ptr.vmem [resolvable:$true] %s60_s8 }
  0x27   :  { %s126_s9 = scalar_lea.vmem %s61_s8, 256  ;;  %p131_p3 = scmp.lt.s32.totalorder %s61_s8, %s61_s8 }
  0x28   :  { %p127_p2 = scmp.ne.s32.totalorder %s61_s8, %s126_s9  ;;  %p132_p4 = scmp.lt.s32.totalorder %s126_s9, %s126_s9 }
  0x2a   :  { %p133_p5 = por %p132_p4, %p131_p3 }
  0x2c   :  { %p134_p6 = pnand %p133_p5, %p127_p2 }
  0x88   :  { %v36_v2 = vpop.permute.xlu0 %35 }
  0x89   :  { %41 = vst.msk [vmem:[#allocation6] sm:$0xff] %vm28_vm0, %v36_v2 }
  0x97   :  { %v38_v3 = vpop.permute.xlu0 %37 }
  0x98   :  { %42 = vst.msk [vmem:[#allocation6 + $0x8] sm:$0xff] %vm28_vm0, %v38_v3 }
  0x99   :  { %137 = shalt.err (!%p134_p6)
}
  0x9a   :  { %s138_s1 = scalar_lea.hbm %s226_s2, 256 }
  0x9b   :  { %p139_p7 = scmp.ne.s32.totalorder %s226_s2, %s138_s1  ;;  %p142_p8 = scmp.lt.u32.totalorder %s138_s1, %s226_s2 }
  0x9d   :  { %p144_p9 = pnand %p142_p8, %p139_p7 }
  0x9f   :  { %147 = shalt.err (!%p144_p9)
}
  0xa0   :  { %66 = dma.vmem_to_hbm [thread:$0]  %s61_s8, 256, %s226_s2, [#allocation7], %s155_s19, %s155_s19, %s156_s20  }
  0xa1   :  { %150 = dma.done.wait [#allocation4], 256  }
  0xa2   :  { %151 = vsyncadd [#allocation4], 4294967040 }
  0xa3   :  { %152 = dma.done.wait [#allocation7], 256  }
  0xa4   :  { %153 = vsyncadd [#allocation7], 4294967040 }
  0xa5   :  { %73 = vsyncpa [#allocation3], 1 }
  0xa6   :  { %74 = vsyncpa [#allocation4], 1 }
  0xa7   :  { %75 = vsyncpa [#allocation7], 1 }

</bundles_post_ra>
